<compile_context>
chip_gen: v7x
topology: tpu7x:2x2x1
jax: 0.10.0
libtpu: 0.0.40
codegen_flags: <defaults>
</compile_context>

<pallas_src>
import functools

import numpy as np
import jax
import jax.numpy as jnp
from jax.experimental import pallas as pl
from jax.experimental.pallas import tpu as pltpu

LANE = 128      # lane width: last dim of every block is a multiple of this
SUBLANE = 8     # sublane width: second-to-last dim multiple


def _round_up(n, m):
    return ((n + m - 1) // m) * m


# ----------------------------------------------------------------------------
# Kernel: one (tb, Hp) tile of y = x @ W^T + b, lane-dense, f32 accumulation.
# ----------------------------------------------------------------------------
def _df_linear_kernel(x_ref, wt_ref, b_ref, o_ref):
    # x_ref : (tb, Hp)  state tile
    # wt_ref: (Hp, Hp)  pre-transposed, zero-padded weight (VMEM-resident,
    #                   constant index_map across the batch grid axis)
    # b_ref : (1, Hp)   zero-padded bias (f32)
    # o_ref : (tb, Hp)  dx/dt tile (lane-dense -> unmasked stores)
    y = jnp.dot(x_ref[...], wt_ref[...], preferred_element_type=jnp.float32)
    o_ref[...] = (y + b_ref[...]).astype(o_ref.dtype)


def _df_linear_padded(x_p, wt_p, b_p, *, tb):
    """Padded linear layer: x_p (Bp,Hp) @ wt_p (Hp,Hp) + b_p (1,Hp)."""
    Bp, Hp = x_p.shape
    grid = (Bp // tb,)
    return pl.pallas_call(
        _df_linear_kernel,
        out_shape=jax.ShapeDtypeStruct((Bp, Hp), jnp.float32),
        grid_spec=pltpu.PrefetchScalarGridSpec(
            num_scalar_prefetch=0,
            grid=grid,
            in_specs=[
                pl.BlockSpec((tb, Hp), lambda i: (i, 0)),   # x tile marches over B
                pl.BlockSpec((Hp, Hp), lambda i: (0, 0)),   # W resident across grid
                pl.BlockSpec((1, Hp), lambda i: (0, 0)),    # bias resident
            ],
            out_specs=pl.BlockSpec((tb, Hp), lambda i: (i, 0)),
        ),
        compiler_params=pltpu.CompilerParams(
            # batch/M axis is independent -> shardable across v7x's 2 TCs.
            dimension_semantics=("parallel",),
        ),
    )(x_p, wt_p, b_p)


@jax.jit
def _df_apply(x, wt_p, b_p):
    """Pad x to (Bp, Hp), run the kernel, slice back to (B, H).

    All shapes are static under jit, so the pad/slice fuse with the launch and
    no per-call transpose/reshape of the parameters is emitted.
    """
    B, H = x.shape
    Hp = wt_p.shape[0]
    Bp = max(_round_up(B, SUBLANE), SUBLANE)
    tb = min(128, Bp)               # fill the MXU M dim when B is large
    Bp = _round_up(Bp, tb)
    x_p = jnp.pad(x.astype(wt_p.dtype), ((0, Bp - B), (0, Hp - H)))
    y_p = _df_linear_padded(x_p, wt_p, b_p, tb=tb)
    return y_p[:B, :H]


# ----------------------------------------------------------------------------
# df(t, x) = A x + b, with A a "Linear" layer exposed as self.A (as in the
# PyTorch module, whose getStiff reads self.df.A.weight).
# ----------------------------------------------------------------------------
class _LinearParams:
    def __init__(self, weight, bias):
        self.weight = weight   # (H_out, H_in), PyTorch convention
        self.bias = bias       # (H,)


class LinearDF:
    def __init__(self, weight, bias, compute_dtype=jnp.float32):
        # compute_dtype=jnp.bfloat16 is recommended for non-trivial H on
        # v6e/v7x (MXU bf16 peak); accumulation stays f32 either way.
        H = weight.shape[0]
        assert weight.shape == (H, H)
        self.A = _LinearParams(weight, bias)
        self.H = H
        self.Hp = _round_up(H, LANE)
        pad = self.Hp - H
        # One-time layout work: pre-transpose + zero-pad to lane-dense HpxHp.
        self.wt_p = jnp.pad(weight.T.astype(compute_dtype), ((0, pad), (0, pad)))
        self.b_p = jnp.pad(bias.astype(jnp.float32), (0, pad)).reshape(1, self.Hp)

    def __call__(self, t, x):
        # t unused: autonomous linear ODE (kept for signature parity).
        return _df_apply(x, self.wt_p, self.b_p)

    def eval_stages(self, t, xs):
        """Fused evaluation of df on S stacked states xs: (S, B, H) -> (S, B, H).

        All stages share one pallas_call, so the weight is DMA'd into VMEM once
        and the MXU sees an M dimension of S*B instead of B.
        """
        S, B, H = xs.shape
        y = _df_apply(xs.reshape(S * B, H), self.wt_p, self.b_p)
        return y.reshape(S, B, H)


# ----------------------------------------------------------------------------
# NODE wrapper (forward semantics identical to the PyTorch module).
# ----------------------------------------------------------------------------
class NODE:
    def __init__(self, df=None, **kwargs):
        self.__dict__.update(kwargs)
        self.df = df
        self.nfe = 0

    def forward(self, t, x):
        self.nfe += 1
        return self.df(t, x)

    def __call__(self, t, x):
        return self.forward(t, x)

    def getStiff(self):
        # TODO(synk): general (nonsymmetric) eigendecomposition has no Pallas /
        # TPU path; computed host-side with numpy, matching the original's
        # use of self.df.A.weight.
        w = np.asarray(self.df.A.weight)
        eigvals = np.abs(np.linalg.eigvals(w))
        return float(np.max(eigvals) / np.min(eigvals))


if __name__ == "__main__":
    B, H = 8, 32  # small shapes: batch=8, hidden=32

    key = jax.random.PRNGKey(0)
    k_w, k_b, k_x = jax.random.split(key, 3)

    # Deterministic init (matches nn.Linear's uniform(-1/sqrt(H), 1/sqrt(H))).
    bound = 1.0 / float(np.sqrt(H))
    weight = jax.random.uniform(k_w, (H, H), jnp.float32, -bound, bound)
    bias = jax.random.uniform(k_b, (H,), jnp.float32, -bound, bound)

    x = jax.random.normal(k_x, (B, H), jnp.float32)
    t = jnp.float32(0.0)

    node = NODE(df=LinearDF(weight, bias))

    # Single evaluation (forward semantics of the PyTorch module).
    out = jax.block_until_ready(node(t, x))
    ref = x @ weight.T + bias
    assert out.shape == (B, H)
    assert jnp.allclose(out, ref, atol=1e-5, rtol=1e-5)
    assert node.nfe == 1

    # Fused multi-stage evaluation (e.g. RK stages) in one pallas_call.
    S = 4
    xs = jnp.stack([x * (1.0 + 0.1 * s) for s in range(S)], axis=0)
    ys = jax.block_until_ready(node.df.eval_stages(t, xs))
    refs = jnp.einsum("sbh,oh->sbo", xs, weight) + bias
    assert ys.shape == (S, B, H)
    assert jnp.allclose(ys, refs, atol=1e-5, rtol=1e-5)

    # getStiff sanity (host-side glue, not a Pallas hot path).
    stiff = node.getStiff()
    assert np.isfinite(stiff) and stiff >= 1.0

    print("KERNEL_OK")
</pallas_src>

<mosaic_0001>
module attributes {stable_mosaic.version = 11 : i64} {
  func.func @_df_linear_kernel(%arg0: i32, %arg1: memref<8x128xf32, #tpu.memory_space<vmem>>, %arg2: memref<128x128xf32, #tpu.memory_space<vmem>>, %arg3: memref<1x128xf32, #tpu.memory_space<vmem>>, %arg4: memref<8x128xf32, #tpu.memory_space<vmem>>) attributes {dimension_semantics = [#tpu.dimension_semantics<parallel>], iteration_bounds = array<i64: 1>, scalar_prefetch = 0 : i64, scratch_operands = 0 : i64, tpu.core_type = #tpu.core_type<tc>, window_params = [{transform_indices = @transform_0, window_bounds = array<i64: 8, 128>}, {pipeline_mode = #tpu.pipeline_mode<synchronous>, transform_indices = @transform_1, window_bounds = array<i64: 128, 128>}, {pipeline_mode = #tpu.pipeline_mode<synchronous>, transform_indices = @transform_2, window_bounds = array<i64: 1, 128>}, {transform_indices = @transform_3, window_bounds = array<i64: 8, 128>}]} {
    %c0 = arith.constant 0 : index
    %c0_0 = arith.constant 0 : index
    %0 = vector.load %arg1[%c0, %c0_0] : memref<8x128xf32, #tpu.memory_space<vmem>>, vector<8x128xf32>
    %c0_1 = arith.constant 0 : index
    %c0_2 = arith.constant 0 : index
    %1 = vector.load %arg2[%c0_1, %c0_2] : memref<128x128xf32, #tpu.memory_space<vmem>>, vector<128x128xf32>
    %cst = arith.constant dense<0.000000e+00> : vector<8x128xf32>
    %2 = tpu.matmul %0, %1, %cst {dimension_numbers = #tpu.dot_dimension_numbers<[1], [0], [0], [1], [0, 0, 1, 1], [], []>} : vector<8x128xf32>, vector<128x128xf32>, vector<8x128xf32> -> vector<8x128xf32>
    %c0_3 = arith.constant 0 : index
    %c0_4 = arith.constant 0 : index
    %3 = vector.load %arg3[%c0_3, %c0_4] : memref<1x128xf32, #tpu.memory_space<vmem>>, vector<1x128xf32>
    %4 = vector.broadcast %3 : vector<1x128xf32> to vector<8x128xf32>
    %5 = arith.addf %2, %4 : vector<8x128xf32>
    %c0_5 = arith.constant 0 : index
    %c0_6 = arith.constant 0 : index
    %6 = vector.load %arg4[%c0_5, %c0_6] : memref<8x128xf32, #tpu.memory_space<vmem>>, vector<8x128xf32>
    tpu.vector_store %arg4[%c0_5, %c0_6], %5 {strides = array<i32>} : memref<8x128xf32, #tpu.memory_space<vmem>>, vector<8x128xf32>,
    return
  }
  func.func @transform_0(%arg0: i32) -> (i32, i32) {
    %c0_i32 = arith.constant 0 : i32
    %c0_i32_0 = arith.constant 0 : i32
    return %arg0, %c0_i32 : i32, i32
  }
  func.func @transform_1(%arg0: i32) -> (i32, i32) {
    %c0_i32 = arith.constant 0 : i32
    %c0_i32_0 = arith.constant 0 : i32
    %c0_i32_1 = arith.constant 0 : i32
    return %c0_i32, %c0_i32_0 : i32, i32
  }
  func.func @transform_2(%arg0: i32) -> (i32, i32) {
    %c0_i32 = arith.constant 0 : i32
    %c0_i32_0 = arith.constant 0 : i32
    %c0_i32_1 = arith.constant 0 : i32
    return %c0_i32, %c0_i32_0 : i32, i32
  }
  func.func @transform_3(%arg0: i32) -> (i32, i32) {
    %c0_i32 = arith.constant 0 : i32
    %c0_i32_0 = arith.constant 0 : i32
    return %arg0, %c0_i32 : i32, i32
  }
}

</mosaic_0001>

<bundles_post_ra>
// kernel: _df_apply.1
= control target key start
LH: loop header
LB: loop body
LE: loop exit
PB: predicated region body
PF: predicated region fallthrough
CT: control target
= control target key end

     0   :  { %8 = vsyncpa [#allocation3], 0  ;;  %s328_s0 = inlined_call_operand.vmem [shape: f32[8,128], index: 0, kind: input, shape index: {}]   ;;  %s329_s1 = inlined_call_operand.hbm [shape: f32[128,128], index: 1, kind: input, shape index: {}]   ;;  %s330_s2 = inlined_call_operand.vmem [shape: f32[1,128], index: 2, kind: input, shape index: {}]   ;;  %s331_s3 = inlined_call_operand.hbm [shape: f32[8,128], index: 3, kind: output, shape index: {}]  }
   0x1   :  { %9 = vsyncpa [#allocation4], 0  ;;  %s271_s12 = smov [#allocation2]   ;;  %s223_s16 = scalar_lea.hbm %s329_s1, 2048 }
   0x2   :  { %s17_s13 = sshll.u32 %s271_s12, 4  ;;  %p224_p0 = scmp.ne.s32.totalorder %s329_s1, %s223_s16  ;;  %s18_s13 = int_to_ptr.vmem [resolvable:$true] %s17_s13 }
   0x3   :  { %p227_p1 = scmp.lt.u32.totalorder %s223_s16, %s329_s1 }
   0x5   :  { %p229_p2 = pnand %p227_p1, %p224_p0 }
   0x7   :  { %232 = shalt.err (!%p229_p2)
}
   0x8   :  { %s233_s21 = scalar_lea.vmem %s18_s13, 2048  ;;  %p238_p4 = scmp.lt.s32.totalorder %s18_s13, %s18_s13 }
   0x9   :  { %p234_p3 = scmp.ne.s32.totalorder %s18_s13, %s233_s21  ;;  %p239_p5 = scmp.lt.s32.totalorder %s233_s21, %s233_s21 }
   0xb   :  { %p240_p6 = por %p239_p5, %p238_p4 }
   0xd   :  { %p241_p7 = pnand %p240_p6, %p234_p3 }
   0xf   :  { %244 = shalt.err (!%p241_p7)
}
  0x10   :  { %s272_s22 = smov 128   ;;  %s273_s23 = smov 8  }
  0x11   :  { %23 = dma.hbm_to_vmem [thread:$0]  %s329_s1, 2048, %s18_s13, [#allocation3], %s272_s22, %s272_s22, %s273_s23  }
  0x12   :  { %267 = dma.done.wait [#allocation3], 2048  }
  0x13   :  { %268 = vsyncadd [#allocation3], 4294965248  ;;  %v274_v0 = vmov 0.0|0.0   ;;  %vm275_vm0 = vmmov 0   ;;  %v276_v1 = vmov 0.0   ;;  %v30_v2 = vld [vmem:[#allocation2] sm:$0xff] }
  0x14   :  { %192 = vmatprep.subr.bf16.mxu0 %v274_v0  ;;  %189 = vmatprep.mubr.msk.f32.mxu0 %vm275_vm0, %v276_v1  ;;  %v31_v3 = vld [vmem:[#allocation2 + $0x8] sm:$0xff]  ;;  %v32_v4 = vld [vmem:[#allocation2 + $0x10] sm:$0xff]  ;;  %v33_v6 = vld [vmem:[#allocation2 + $0x18] sm:$0xff]  ;;  %s277_s29 = smov [#allocation5]  }
  0x15   :  { %v193_v5 = vpack.c.bf16 %v31_v3, %v30_v2  ;;  %v196_v7 = vpack.c.bf16 %v33_v6, %v32_v4  ;;  %v34_v8 = vld [vmem:[#allocation2 + $0x20] sm:$0xff]  ;;  %v35_v9 = vld [vmem:[#allocation2 + $0x28] sm:$0xff]  ;;  %v36_v11 = vld [vmem:[#allocation2 + $0x30] sm:$0xff]  ;;  %s130_s30 = sshll.u32 %s277_s29, 4  ;;  %s131_s30 = int_to_ptr.vmem [resolvable:$true] %s130_s30 }
  0x16   :  { %v199_v10 = vpack.c.bf16 %v35_v9, %v34_v8  ;;  %v37_v12 = vld [vmem:[#allocation2 + $0x38] sm:$0xff]  ;;  %v38_v14 = vld [vmem:[#allocation2 + $0x40] sm:$0xff]  ;;  %v39_v15 = vld [vmem:[#allocation2 + $0x48] sm:$0xff]  ;;  %s245_s4 = scalar_lea.vmem %s131_s30, 128  ;;  %p250_p9 = scmp.lt.s32.totalorder %s131_s30, %s131_s30 }
  0x17   :  { %194 = vmatpush3.bf16.msra.mxu0 %v193_v5  ;;  %v202_v13 = vpack.c.bf16 %v37_v12, %v36_v11  ;;  %v205_v16 = vpack.c.bf16 %v39_v15, %v38_v14  ;;  %v40_v17 = vld [vmem:[#allocation2 + $0x50] sm:$0xff]  ;;  %v41_v18 = vld [vmem:[#allocation2 + $0x58] sm:$0xff]  ;;  %v42_v20 = vld [vmem:[#allocation2 + $0x60] sm:$0xff]  ;;  %p246_p8 = scmp.ne.s32.totalorder %s131_s30, %s245_s4  ;;  %p251_p10 = scmp.lt.s32.totalorder %s245_s4, %s245_s4 }
  0x18   :  { %195 = vmatprep.subr.bf16.mxu0 %v274_v0  ;;  %v208_v19 = vpack.c.bf16 %v41_v18, %v40_v17  ;;  %v43_v21 = vld [vmem:[#allocation2 + $0x68] sm:$0xff]  ;;  %v44_v23 = vld [vmem:[#allocation2 + $0x70] sm:$0xff]  ;;  %v45_v24 = vld [vmem:[#allocation2 + $0x78] sm:$0xff] }
  0x19   :  { %v211_v22 = vpack.c.bf16 %v43_v21, %v42_v20  ;;  %v214_v25 = vpack.c.bf16 %v45_v24, %v44_v23  ;;  %v29_v26 = vld [vmem:[%s328_s0] sm:$0xff]  ;;  %p252_p11 = por %p251_p10, %p250_p9 }
  0x1a   :  { %v139_v27 = vld [vmem:[%s330_s2] ss:$0 sm:$0xff] }
  0x1b   :  { %197 = vmatpush3.bf16.msra.mxu0 %v196_v7  ;;  %p253_p12 = pnand %p252_p11, %p246_p8 }
  0x1c   :  { %198 = vmatprep.subr.bf16.mxu0 %v274_v0 }
  0x1f   :  { %200 = vmatpush3.bf16.msra.mxu0 %v199_v10 }
  0x20   :  { %201 = vmatprep.subr.bf16.mxu0 %v274_v0 }
  0x23   :  { %203 = vmatpush3.bf16.msra.mxu0 %v202_v13 }
  0x24   :  { %204 = vmatprep.subr.bf16.mxu0 %v274_v0 }
  0x27   :  { %206 = vmatpush3.bf16.msra.mxu0 %v205_v16 }
  0x28   :  { %207 = vmatprep.subr.bf16.mxu0 %v274_v0 }
  0x2b   :  { %209 = vmatpush3.bf16.msra.mxu0 %v208_v19 }
  0x2c   :  { %210 = vmatprep.subr.bf16.mxu0 %v274_v0 }
  0x2f   :  { %212 = vmatpush3.bf16.msra.mxu0 %v211_v22 }
  0x30   :  { %213 = vmatprep.subr.bf16.mxu0 %v274_v0 }
  0x33   :  { %215 = vmatpush3.bf16.msra.mxu0 %v214_v25 }
  0x36   :  { %190 = vmatmul.mubr.f32.vlgmr.msra.gmra.mrb[0].mxu0 %v29_v26 }
 0x109   :  { %v119_v28 = vpop.f32.mrb[0].mxu0 }
 0x10a   :  { %v120_v29 = vadd.f32 %v139_v27, %v119_v28  ;;  %v191_v30 = vpop.f32.mrb[1].mxu0 }
 0x10c   :  { %123 = vst [vmem:[#allocation5] sm:$0xff] %v120_v29 }
 0x10d   :  { %256 = shalt.err (!%p253_p12)
}
 0x10e   :  { %s257_s6 = scalar_lea.hbm %s331_s3, 128 }
 0x10f   :  { %p258_p13 = scmp.ne.s32.totalorder %s331_s3, %s257_s6  ;;  %p261_p0 = scmp.lt.u32.totalorder %s257_s6, %s331_s3 }
 0x111   :  { %p263_p1 = pnand %p261_p0, %p258_p13 }
 0x113   :  { %266 = shalt.err (!%p263_p1)
}
 0x114   :  { %133 = dma.vmem_to_hbm [thread:$0]  %s131_s30, 128, %s331_s3, [#allocation4]  }
 0x115   :  { %269 = dma.done.wait [#allocation4], 128  }
 0x116   :  { %270 = vsyncadd [#allocation4], 4294967168 }
 0x117   :  { %137 = vsyncpa [#allocation3], 1 }
 0x118   :  { %138 = vsyncpa [#allocation4], 1 }

</bundles_post_ra>
